<compile_context>
chip_gen: v5e
topology: v5e:2x2
jax: 0.10.0
libtpu: 0.0.40
codegen_flags: <defaults>
</compile_context>

<pallas_src>
from functools import partial

import jax
import jax.numpy as jnp
from jax.experimental import pallas as pl
from jax.experimental.pallas import tpu as pltpu


def _round_up(a, b):
    return ((a + b - 1) // b) * b


def _cdilated_kernel(xm_ref, xh_ref, w_ref, o_ref, *, taps):
    """One (batch, L-tile) grid step.

    xm_ref: (S, C_in, TL)   main (phase-split) input window for this tile
    xh_ref: (S, C_in, H)    halo window = first H columns of the next tile
    w_ref : (C_out, k*C_in) tap-folded weights
    o_ref : (C_out, TL)     output tile
    """
    main_rows = {}
    halo_rows = {}
    wins = []
    for q, r in taps:                      # q, r are static Python ints
        if r not in main_rows:
            main_rows[r] = xm_ref[r]       # (C_in, TL)
        base = main_rows[r]
        if q == 0:
            wins.append(base)
        else:
            if r not in halo_rows:
                halo_rows[r] = xh_ref[r]   # (C_in, H)
            wins.append(
                jnp.concatenate([base[:, q:], halo_rows[r][:, :q]], axis=-1))
    rhs = wins[0] if len(wins) == 1 else jnp.concatenate(wins, axis=0)
    # Single MXU matmul: (C_out, k*C_in) @ (k*C_in, TL), f32 accumulation.
    o_ref[...] = jnp.dot(
        w_ref[...], rhs, preferred_element_type=jnp.float32
    ).astype(o_ref.dtype)


def cdilated_forward(x, w, *, stride=1, d=1, l_tile=None, compute_dtype=None):
    """Forward pass of CDilated (PyTorch Conv1d, bias=False, dilation=d).

    x: (N, C_in, L) float32
    w: (C_out, C_in, k) PyTorch Conv1d weight layout
    l_tile: output-length tile; None -> auto-size under a small VMEM budget.
    compute_dtype: optionally jnp.bfloat16 (memory-bound regime on v5e/v6e);
                   accumulation stays in f32.
    """
    n, c_in, l = x.shape
    c_out, c_in_w, k = w.shape
    assert c_in_w == c_in
    s = int(stride)
    d = int(d)
    pad = ((k - 1) // 2) * d
    l_pad = l + 2 * pad
    l_out = (l_pad - d * (k - 1) - 1) // s + 1
    assert l_out > 0

    # Per-tap (column offset q, stride-phase r) in the phase-split input:
    #   x_phase[r, c, m] = x_padded[c, m*s + r],  tap t reads columns q_t + m.
    taps = tuple(((t * d) // s, (t * d) % s) for t in range(k))
    q_max = max(q for q, _ in taps)

    # Halo width (multiple of 128, >= q_max).
    h = max(128, _round_up(max(q_max, 1), 128))
    assert q_max <= h

    # L tile: multiple of h (hence of 128), >= 128, bounded by the output size.
    itemsize = jnp.dtype(compute_dtype if compute_dtype is not None
                         else x.dtype).itemsize
    if l_tile is None:
        # Double-buffered main-input + output bytes per output column.
        per_col = 2 * (s * c_in + c_out) * itemsize
        l_tile = max(128, min(2048, (6 * 1024 * 1024) // max(per_col, 1)))
    tl = _round_up(min(max(int(l_tile), 128), _round_up(l_out, 128)), h)
    num_tiles = -(-l_out // tl)                 # cdiv
    l_out_p = num_tiles * tl
    m_pad = l_out_p + h                          # main tiles + one halo block

    # ---- wrapper glue (plain XLA): zero-pad + stride-phase split -----------
    total = m_pad * s
    if total >= l_pad:
        x_p = jnp.pad(x, ((0, 0), (0, 0), (pad, total - l - pad)))
    else:
        # Columns beyond m_pad are never needed for kept outputs; truncate so
        # the reshape is exact (affected outputs are discarded below).
        x_p = jnp.pad(x, ((0, 0), (0, 0), (pad, pad)))[:, :, :total]
    # x_ph[n, r, c, m] = x_padded[n, c, m*s + r]
    x_ph = x_p.reshape(n, c_in, m_pad, s).transpose(0, 3, 1, 2)

    # Fold taps into the contraction dim: w_f[o, t*C_in + c] = w[o, c, t].
    w_f = jnp.transpose(w, (0, 2, 1)).reshape(c_out, k * c_in)

    if compute_dtype is not None:
        x_ph = x_ph.astype(compute_dtype)
        w_f = w_f.astype(compute_dtype)

    kernel = partial(_cdilated_kernel, taps=taps)

    cost = pl.CostEstimate(
        flops=2 * n * c_out * c_in * k * l_out,
        transcendentals=0,
        bytes_accessed=(x_ph.size * x_ph.dtype.itemsize
                        + w_f.size * w_f.dtype.itemsize
                        + n * c_out * l_out_p * x.dtype.itemsize),
    )

    out_p = pl.pallas_call(
        kernel,
        out_shape=jax.ShapeDtypeStruct((n, c_out, l_out_p), x.dtype),
        grid_spec=pltpu.PrefetchScalarGridSpec(
            num_scalar_prefetch=0,
            grid=(n, num_tiles),
            in_specs=[
                # Main input window for this L tile.
                pl.BlockSpec((None, s, c_in, tl),
                             lambda b, j: (b, 0, 0, j)),
                # Halo: first h columns of the *next* tile (same array).
                pl.BlockSpec((None, s, c_in, h),
                             lambda b, j: (b, 0, 0, (j + 1) * (tl // h))),
                # Tap-folded weights, resident every step.
                pl.BlockSpec((c_out, k * c_in), lambda b, j: (0, 0)),
            ],
            out_specs=pl.BlockSpec((None, c_out, tl), lambda b, j: (b, 0, j)),
        ),
        compiler_params=pltpu.CompilerParams(
            dimension_semantics=("parallel", "parallel")),
        cost_estimate=cost,
    )(x_ph, x_ph, w_f)

    return out_p[:, :, :l_out]


if __name__ == "__main__":
    # Module hyper-parameters (CDilated(nIn, nOut, kSize, stride, d)).
    nIn, nOut, kSize = 4, 8, 3
    N, L = 2, 16

    key = jax.random.PRNGKey(0)
    kx, kw = jax.random.split(key)
    x = jax.random.normal(kx, (N, nIn, L), dtype=jnp.float32)
    bound = 1.0 / (nIn * kSize) ** 0.5
    w = jax.random.uniform(kw, (nOut, nIn, kSize), dtype=jnp.float32,
                           minval=-bound, maxval=bound)

    def _ref(x, w, stride, d):
        pad = ((kSize - 1) // 2) * d
        return jax.lax.conv_general_dilated(
            x, w, window_strides=(stride,), padding=[(pad, pad)],
            rhs_dilation=(d,), dimension_numbers=("NCH", "OIH", "NCH"))

    # Primary config: stride=1, dilation=2.
    out = cdilated_forward(x, w, stride=1, d=2)
    out = jax.block_until_ready(out)
    ref = _ref(x, w, 1, 2)
    assert out.shape == ref.shape, (out.shape, ref.shape)
    assert jnp.allclose(out, ref, atol=1e-5, rtol=1e-5), "mismatch (stride=1,d=2)"

    # Also exercise the stride>1 phase-split path: stride=2, dilation=1.
    out2 = cdilated_forward(x, w, stride=2, d=1)
    out2 = jax.block_until_ready(out2)
    ref2 = _ref(x, w, 2, 1)
    assert out2.shape == ref2.shape, (out2.shape, ref2.shape)
    assert jnp.allclose(out2, ref2, atol=1e-5, rtol=1e-5), "mismatch (stride=2,d=1)"

    print("KERNEL_OK")
</pallas_src>

<mosaic_0001>
module attributes {stable_mosaic.version = 11 : i64} {
  func.func @_cdilated_kernel(%arg0: i32, %arg1: i32, %arg2: memref<1x1x4x128xf32, #tpu.memory_space<vmem>>, %arg3: memref<1x1x4x128xf32, #tpu.memory_space<vmem>>, %arg4: memref<8x12xf32, #tpu.memory_space<vmem>>, %arg5: memref<1x8x128xf32, #tpu.memory_space<vmem>>) attributes {dimension_semantics = [#tpu.dimension_semantics<parallel>, #tpu.dimension_semantics<parallel>], iteration_bounds = array<i64: 2, 1>, scalar_prefetch = 0 : i64, scratch_operands = 0 : i64, tpu.core_type = #tpu.core_type<tc>, window_params = [{transform_indices = @transform_0, window_bounds = array<i64: 1, 1, 4, 128>}, {transform_indices = @transform_1, window_bounds = array<i64: 1, 1, 4, 128>}, {pipeline_mode = #tpu.pipeline_mode<synchronous>, transform_indices = @transform_2, window_bounds = array<i64: 8, 12>}, {transform_indices = @transform_3, window_bounds = array<i64: 1, 8, 128>}]} {
    %c0 = arith.constant 0 : index
    %c0_0 = arith.constant 0 : index
    %c0_1 = arith.constant 0 : index
    %c0_2 = arith.constant 0 : index
    %0 = vector.load %arg2[%c0, %c0_0, %c0_1, %c0_2] : memref<1x1x4x128xf32, #tpu.memory_space<vmem>>, vector<1x1x4x128xf32>
    %1 = vector.shape_cast %0 : vector<1x1x4x128xf32> to vector<4x128xf32>
    %c0_3 = arith.constant 0 : index
    %c0_4 = arith.constant 0 : index
    %c0_5 = arith.constant 0 : index
    %c0_6 = arith.constant 0 : index
    %2 = vector.load %arg3[%c0_3, %c0_4, %c0_5, %c0_6] : memref<1x1x4x128xf32, #tpu.memory_space<vmem>>, vector<1x1x4x128xf32>
    %3 = vector.shape_cast %2 : vector<1x1x4x128xf32> to vector<4x128xf32>
    %4 = vector.extract_strided_slice %1 {offsets = [0, 2], sizes = [4, 126], strides = [1, 1]} : vector<4x128xf32> to vector<4x126xf32>
    %5 = vector.extract_strided_slice %3 {offsets = [0, 0], sizes = [4, 2], strides = [1, 1]} : vector<4x128xf32> to vector<4x2xf32>
    %6 = tpu.concatenate %4, %5 in 1 : vector<4x126xf32>, vector<4x2xf32> -> vector<4x128xf32>
    %7 = vector.extract_strided_slice %1 {offsets = [0, 4], sizes = [4, 124], strides = [1, 1]} : vector<4x128xf32> to vector<4x124xf32>
    %8 = vector.extract_strided_slice %3 {offsets = [0, 0], sizes = [4, 4], strides = [1, 1]} : vector<4x128xf32> to vector<4x4xf32>
    %9 = tpu.concatenate %7, %8 in 1 : vector<4x124xf32>, vector<4x4xf32> -> vector<4x128xf32>
    %10 = tpu.concatenate %1, %6, %9 in 0 : vector<4x128xf32>, vector<4x128xf32>, vector<4x128xf32> -> vector<12x128xf32>
    %c0_7 = arith.constant 0 : index
    %c0_8 = arith.constant 0 : index
    %11 = vector.load %arg4[%c0_7, %c0_8] : memref<8x12xf32, #tpu.memory_space<vmem>>, vector<8x12xf32>
    %cst = arith.constant dense<0.000000e+00> : vector<8x128xf32>
    %12 = tpu.matmul %11, %10, %cst {dimension_numbers = #tpu.dot_dimension_numbers<[1], [0], [0], [1], [0, 0, 1, 1], [], []>} : vector<8x12xf32>, vector<12x128xf32>, vector<8x128xf32> -> vector<8x128xf32>
    %c0_9 = arith.constant 0 : index
    %c0_10 = arith.constant 0 : index
    %c0_11 = arith.constant 0 : index
    %13 = vector.load %arg5[%c0_9, %c0_10, %c0_11] : memref<1x8x128xf32, #tpu.memory_space<vmem>>, vector<1x8x128xf32>
    %14 = vector.shape_cast %13 : vector<1x8x128xf32> to vector<8x128xf32>
    %15 = vector.shape_cast %12 : vector<8x128xf32> to vector<1x8x128xf32>
    tpu.vector_store %arg5[%c0_9, %c0_10, %c0_11], %15 {strides = array<i32>} : memref<1x8x128xf32, #tpu.memory_space<vmem>>, vector<1x8x128xf32>,
    return
  }
  func.func @transform_0(%arg0: i32, %arg1: i32) -> (i32, i32, i32, i32) {
    %c0_i32 = arith.constant 0 : i32
    %c0_i32_0 = arith.constant 0 : i32
    %c0_i32_1 = arith.constant 0 : i32
    return %arg0, %c0_i32, %c0_i32_0, %arg1 : i32, i32, i32, i32
  }
  func.func @transform_1(%arg0: i32, %arg1: i32) -> (i32, i32, i32, i32) {
    %c1_i32 = arith.constant 1 : i32
    %0 = arith.addi %arg1, %c1_i32 : i32
    %c1_i32_0 = arith.constant 1 : i32
    %1 = arith.muli %0, %c1_i32_0 : i32
    %c0_i32 = arith.constant 0 : i32
    %c0_i32_1 = arith.constant 0 : i32
    %c0_i32_2 = arith.constant 0 : i32
    return %arg0, %c0_i32, %c0_i32_1, %1 : i32, i32, i32, i32
  }
  func.func @transform_2(%arg0: i32, %arg1: i32) -> (i32, i32) {
    %c0_i32 = arith.constant 0 : i32
    %c0_i32_0 = arith.constant 0 : i32
    %c0_i32_1 = arith.constant 0 : i32
    return %c0_i32, %c0_i32_0 : i32, i32
  }
  func.func @transform_3(%arg0: i32, %arg1: i32) -> (i32, i32, i32) {
    %c0_i32 = arith.constant 0 : i32
    %c0_i32_0 = arith.constant 0 : i32
    return %arg0, %c0_i32, %arg1 : i32, i32, i32
  }
}

</mosaic_0001>

<bundles_post_ra>
// kernel: tpu_custom_call.1
= control target key start
LH: loop header
LB: loop body
LE: loop exit
PB: predicated region body
PF: predicated region fallthrough
CT: control target
= control target key end

     0   :  { %s923_s0 = inlined_call_operand.hbm [shape: f32[2,1,4,256], index: 0, kind: input, shape index: {}]   ;;  %s924_s1 = inlined_call_operand.hbm [shape: f32[2,1,4,256], index: 1, kind: input, shape index: {}]   ;;  %s925_s2 = inlined_call_operand.hbm [shape: f32[8,12], index: 2, kind: input, shape index: {}]   ;;  %s926_s3 = inlined_call_operand.hbm [shape: f32[2,8,128], index: 3, kind: output, shape index: {}]  }
   0x1   :  { %930 = sst [smem:[#allocation17_spill]] %s925_s2 }
   0x2   :  { %8 = vsyncpa [#allocation3], 0 }
   0x3   :  { %10 = vsyncpa [#allocation3 + $0x1], 0 }
   0x4   :  { %11 = vsyncpa [#allocation6], 0 }
   0x5   :  { %13 = vsyncpa [#allocation6 + $0x1], 0 }
   0x6   :  { %14 = vsyncpa [#allocation4], 0 }
   0x7   :  { %16 = vsyncpa [#allocation4 + $0x1], 0  ;;  %s768_s12 = smov 0   ;;  %s770_s13 = smov 0  }
   0x8   :  { %s772_s14 = smov 0   ;;  %s774_s15 = smov 0  }
   0x9   :  { %s776_s16 = smov 0   ;;  %s778_s17 = smov 0  }
   0xa LB: > { %931 = sst [smem:[#allocation13_spill]] %s731_s14  ;;  %s799_s18 = sadd.s32 4294967295, %s743_s17   ;;  %s743_s17 = sphi %s778_s17, %s22_s17   ;;  %s739_s16 = sphi %s776_s16, %s944_s16   ;;  %s735_s15 = sphi %s774_s15, %s943_s15   ;;  %s731_s14 = sphi %s772_s14, %s942_s14   ;;  %s727_s13 = sphi %s770_s13, %s946_s13   ;;  %s723_s12 = sphi %s768_s12, %s945_s12  }
   0xb   : > { %932 = sst [smem:[#allocation14_spill]] %s739_s16  ;;  %s455_s19 = sadd.s32 4294967294, %s743_s17  }
   0xc   : > { %p56_p0 = scmp.ne.s32.totalorder %s727_s13, %s723_s12  ;;  %p57_p1 = scmp.eq.s32.totalorder %s799_s18, 0 }
   0xd   : > { %p133_p2 = scmp.eq.s32.totalorder %s799_s18, 1  ;;  %p139_p3 = scmp.eq.s32.totalorder %s455_s19, 1 }
   0xe   : > { %p808_p4 = por %p57_p1, %p56_p0  ;;  %p456_p5 = scmp.ge.s32.totalorder %s743_s17, 1 }
   0xf   : > { %p813_p6 = por %p139_p3, %p56_p0  ;;  %p146_p7 = scmp.lt.s32.totalorder %s743_s17, 3 }
  0x10   : > { %s935_s2 = sld [smem:[#allocation17_spill]]  ;;  %p458_p9 = scmp.ge.s32.totalorder %s743_s17, 2 }
  0x11   : > { %p821_p8 = pnand %p456_p5, %p146_p7  ;;  %s745_s26 = smov [#allocation7]  }
  0x12   : > { %s160_s27 = sshll.u32 %s745_s26, 4  ;;  %s34_s28 = sadd.s32 1, %s739_s16  ;;  %s161_s27 = int_to_ptr.vmem [resolvable:$true] %s160_s27 }
  0x13   : > { %p488_p10 = pneg %p821_p8  ;;  %p36_p12 = scmp.ge.s32.totalorder %s34_s28, 2 }
  0x14   : > { %s43_s29 = sadd.s32 1, %s731_s14  ;;  %p50_p13 = scmp.ne.s32.totalorder %s731_s14, %s727_s13 }
  0x15   : > { %p489_p11 = pnand %p488_p10, %p57_p1  ;;  %p51_p0 = scmp.eq.s32.totalorder %s743_s17, 0 }
  0x16   : > { %s158_s24 = sshll.u32 %s935_s2, 4  ;;  %s948_s28 = smov (%p36_p12, %s34_s28), 0  ;;  %s159_s24 = int_to_ptr.hbm [resolvable:$true] %s158_s24 }
  0x17   : > { %491 = dma.hbm_to_vmem [thread:$0]  (!%p489_p11), %s159_s24, 128, %s161_s27, [#allocation6]  }
  0x18   : > { %937 = sst [smem:[#allocation15_spill]] %s948_s28  ;;  %p837_p3 = por %p51_p0, %p50_p13 }
  0x19   : > { %p843_p5 = por %p133_p2, %p50_p13  ;;  %s38_s5 = ssub.s32 %s739_s16, %s948_s28 }
  0x1a   : > { %p504_p7 = scmp.lt.s32.totalorder %s743_s17, 2  ;;  %p41_p10 = scmp.eq.s32.totalorder %s38_s5, 0 }
  0x1b   : > { %s171_s6 = sand.u32 1, %s731_s14   ;;  %s476_s9 = sshll.u32 %s739_s16, 3 }
  0x1c   : > { %s459_s7 = sshll.u32 %s171_s6, 2  ;;  %s181_s19 = scalar_lea.hbm %s923_s0, %s476_s9 }
  0x1d   : > { %s852_s8 = scalar_select %p41_p10, %s731_s14, %s43_s29  }
  0x1e   : > { %s175_s22 = scalar_lea.vmem [#allocation2], %s459_s7  ;;  %s183_s24 = sshll.u32 %s181_s19, 4  ;;  %s184_s24 = int_to_ptr.hbm [resolvable:$true] %s183_s24 }
  0x1f   : > { %940 = sst [smem:[#allocation16_spill]] %s852_s8  ;;  %s185_s23 = sshll.u32 %s175_s22, 4  ;;  %s186_s23 = int_to_ptr.vmem [resolvable:$true] %s185_s23 }
  0x20   : > { %p493_p2 = pnand %p504_p7, %p837_p3  ;;  %s378_s5 = scalar_lea.hbm %s924_s1, %s476_s9 }
  0x21   : > { %s192_s2 = sand.u32 1, %s743_s17   ;;  %s172_s28 = scalar_lea.sflag [#allocation3], %s171_s6 }
  0x22   : > { %495 = dma.hbm_to_vmem [thread:$0]  (!%p493_p2), %s184_s24, 64, %s186_s23, %s172_s28  }
  0x23   : > { %s379_s29 = scalar_lea.hbm %s378_s5, 4  ;;  %s196_s8 = scalar_lea.vmem [#allocation5], %s459_s7 }
  0x24   : > { %s205_s16 = sshll.u32 %s379_s29, 4  ;;  %s207_s14 = sshll.u32 %s196_s8, 4  ;;  %s206_s16 = int_to_ptr.hbm [resolvable:$true] %s205_s16  ;;  %s208_s14 = int_to_ptr.vmem [resolvable:$true] %s207_s14 }
  0x25   : > { %s193_s10 = scalar_lea.sflag [#allocation6], %s192_s2  ;;  %216 = sbr.rel (%p821_p8) target bundleno = 307 (0x133), region = 32 }
  0x26   : > { %498 = dma.hbm_to_vmem [thread:$0]  (!%p493_p2), %s206_s16, 64, %s208_s14, %s193_s10  }
  0x27   : > { %s867_s30 = sand.u32 (!%p821_p8), 1, %s727_s13  }
  0x28   : > { %s466_s9 = sshll.u32 (!%p821_p8), %s867_s30, 2  ;;  %s219_s6 = scalar_lea.sflag (!%p821_p8), [#allocation3], %s867_s30 }
  0x29   : > { %s222_s28 = scalar_lea.vmem (!%p821_p8), [#allocation2], %s466_s9 }
  0x2a   : > { %706 = dma.done.wait (%p808_p4), %s219_s6, 64  }
  0x2b   : > { %708 = vsyncadd (%p808_p4), %s219_s6, 4294967232  ;;  %s228_s2 = sand.u32 1, %s799_s18   ;;  %s232_s16 = scalar_lea.vmem [#allocation5], %s466_s9 }
  0x2c   : > { %s229_s14 = scalar_lea.sflag [#allocation6], %s228_s2 }
  0x2d   : > { %710 = dma.done.wait (%p808_p4), %s229_s14, 64  }
  0x2e   : > { %712 = vsyncadd (%p808_p4), %s229_s14, 4294967232 }
  0x2f   : > { %714 = dma.done.wait (%p57_p1), [#allocation6], 128  }
  0x30   : > { %716 = vsyncadd (%p57_p1), [#allocation6], 4294967168  ;;  %v267_v0 = vld [vmem:[%s222_s28] sm:$0xf]  ;;  %v268_v1 = vld [vmem:[%s232_s16] sm:$0xf] }
  0x31   : > { %v558_v2 = vpack.i.bf16 %v268_v1, %v267_v0  ;;  %s746_s25 = smov 124   ;;  %s747_s7 = smov 126   ;;  %vm277_vm0 = vcmask 1031168   ;;  %vm285_vm1 = vcmask 1014784   ;;  %vm290_vm2 = vcmask 1043456   ;;  %v292_v11 = vld [vmem:[#allocation7] sm:$0xff] }
  0x32   : > { %282 = vrot.lane.b32.xlu1 %v268_v1, %s746_s25  ;;  %vm293_vm3 = vcmask 97280   ;;  %s469_s18 = sshll.u32 %s867_s30, 3  ;;  %s473_s20 = sshll.u32 %s735_s15, 3 }
  0x33   : > { %559 = vrot.lane.b32.xlu0 %v558_v2, %s747_s7  ;;  %s333_s19 = scalar_lea.hbm %s926_s3, %s473_s20  ;;  %s265_s22 = scalar_lea.vmem [#allocation8], %s469_s18 }
  0x34   : > { %s335_s23 = sshll.u32 %s265_s22, 4  ;;  %s337_s24 = sshll.u32 %s333_s19, 4  ;;  %s336_s23 = int_to_ptr.vmem [resolvable:$true] %s335_s23  ;;  %s338_s24 = int_to_ptr.hbm [resolvable:$true] %s337_s24 }
  0x35   : > { %s322_s26 = scalar_lea.sflag [#allocation4], %s867_s30  ;;  %s667_s27 = sshra.s32 %s338_s24, 4  ;;  %s668_s27 = int_to_ptr.hbm [resolvable:$true] %s667_s27 }
  0x36   : > { %s669_s5 = scalar_lea.hbm %s668_s27, 8  ;;  %s673_s10 = scalar_lea.hbm %s926_s3, 16 }
  0x37   : > { %p670_p1 = scmp.ne.s32.totalorder %s668_s27, %s669_s5  ;;  %p674_p11 = scmp.lt.s32.totalorder %s668_s27, %s926_s3 }
  0x38   : > { %p675_p12 = scmp.lt.s32.totalorder %s673_s10, %s669_s5 }
  0x39   : > { %p671_p4 = pnand %p670_p1, %p843_p5 }
  0x3a   : > { %p676_p13 = por %p675_p12, %p674_p11 }
  0x3b   : > { %279 = vrot.lane.b32.xlu0 %v267_v0, %s746_s25  ;;  %p672_p8 = pneg %p671_p4 }
  0x3d   : > { %p677_p0 = pnand %p676_p13, %p672_p8 }
  0xa4   : > { %v283_v7 = vpop.permute.xlu1 %282 }
  0xa5   : > { %v560_v3 = vpop.permute.xlu0 %559 }
  0xa6   : > { %v562_v4 = vunpack.i.h.bf16 %v560_v3  ;;  %v561_v5 = vunpack.i.l.bf16 %v560_v3 }
  0xa8   : > { %v278_v6 = vsel %vm277_vm0, %v561_v5, %v562_v4 }
  0xa9   : > { %v288_v8 = vrot.slane %v278_v6, 4 }
  0xab   : > { %v291_v12 = vsel %vm290_vm2, %v267_v0, %v288_v8 }
  0xad   : > { %v280_v9 = vpop.permute.xlu0 %279 }
  0xae   : > { %v286_v10 = vsel %vm285_vm1, %v280_v9, %v283_v7 }
  0xaf   : > { %470 = vmatpush.msk.msra.mxu0 %vm290_vm2, %v286_v10 }
  0xb1   : > { %315 = vmatpush.msra.mxu0 %v291_v12 }
  0xb2   : > { %471 = vmatmul.msk.f32.vlgmr.msra.gmra.mxu0 %vm293_vm3, %v292_v11 }
 0x12f   : > { %v317_v13 = vpop.f32.mrf.mxu0 }
 0x130   : > { %320 = vst [vmem:[%s265_s22] sm:$0xff] %v317_v13 }
 0x131   : > { %680 = shalt.err (!%p677_p0)
}
 0x132   : > { %486 = dma.vmem_to_hbm [thread:$0]  (%p843_p5), %s336_s23, 128, %s338_s24, %s322_s26  }
 0x133 PF: > { %s349_s30 = sand.u32 1, %s723_s12   ;;  %p500_p3 = pnand %p458_p9, %p813_p6 }
 0x134   : > { %s350_s28 = scalar_lea.sflag [#allocation4], %s349_s30 }
 0x135   : > { %p501_p7 = pneg %p500_p3 }
 0x137   : > { %718 = dma.done.wait (%p501_p7), %s350_s28, 128  }
 0x138   : > { %720 = vsyncadd (%p501_p7), %s350_s28, 4294967168  ;;  %s22_s17 = sadd.s32 1, %s743_s17   ;;  %s941_s2 = sld [smem:[#allocation13_spill]] }
 0x139   : > { %p19_p10 = scmp.ge.s32.totalorder %s22_s17, 4   ;;  %s942_s14 = sld [smem:[#allocation16_spill]] }
 0x13a   : > { %s943_s15 = sld [smem:[#allocation14_spill]]  ;;  %s945_s12 = smov %s727_s13 }
 0x13b   : > { %s944_s16 = sld [smem:[#allocation15_spill]]  ;;  %21 = sbr.rel (!%p19_p10) target bundleno = 10 (0xa), region = 94 }
 0x13e   : > { %s946_s13 = smov %s941_s2 }
 0x140   :  { %356 = vsyncpa [#allocation3], 1 }
 0x141   :  { %358 = vsyncpa [#allocation3 + $0x1], 1 }
 0x142   :  { %359 = vsyncpa [#allocation6], 1 }
 0x143   :  { %361 = vsyncpa [#allocation6 + $0x1], 1 }
 0x144   :  { %362 = vsyncpa [#allocation4], 1 }
 0x145   :  { %364 = vsyncpa [#allocation4 + $0x1], 1 }

</bundles_post_ra>
